<compile_context>
chip_gen: v6e
topology: v6e:2x2x1
jax: 0.10.0
libtpu: 0.0.40
codegen_flags: <defaults>
</compile_context>

<pallas_src>
import functools

import jax
import jax.numpy as jnp
from jax.experimental import pallas as pl
from jax.experimental.pallas import tpu as pltpu


def _round_up(n: int, m: int) -> int:
    return ((n + m - 1) // m) * m


def _fused_mlp_kernel(*refs, relu_flags, out_features):
    """refs = (x_ref, w0, b0, w1, b1, ..., o_ref). Everything VMEM-resident.

    Computes h = relu?(h @ W_i + b_i) layer by layer; intermediates never leave VMEM.
    Weights are [K, N_pad] (N_pad = 128-multiple); layer-0 K is the true in_features.
    Padded output lanes carry exact zeros (zero weight cols / zero bias lanes), so the
    final static slice to out_features is exact.
    """
    x_ref = refs[0]
    o_ref = refs[-1]
    wb_refs = refs[1:-1]

    h = x_ref[...]                              # [B, in_features] f32
    for i, relu in enumerate(relu_flags):
        w = wb_refs[2 * i][...]                 # [K_i, Npad_i]
        b = wb_refs[2 * i + 1][...]             # [1, Npad_i]
        h = jnp.dot(h, w,
                    preferred_element_type=jnp.float32,
                    precision=jax.lax.Precision.HIGHEST) + b
        if relu:
            h = jnp.maximum(h, 0.0)
        # Dropout: identity in eval mode.
    o_ref[...] = h[:, :out_features].astype(o_ref.dtype)


def _fused_mlp_forward(x, flat_params, *, relu_flags, out_features, vmem_limit_bytes,
                       tile_m=256):
    """x: [B, in_features] f32. flat_params: [W0, b0, W1, b1, ...] (kernel layout)."""
    B, _ = x.shape
    n_inputs = 1 + len(flat_params)

    kernel = functools.partial(
        _fused_mlp_kernel, relu_flags=relu_flags, out_features=out_features)

    flops = 2 * B * sum(w.shape[0] * w.shape[1] for w in flat_params[0::2])
    bytes_accessed = 4 * (x.size + sum(int(p.size) for p in flat_params)
                          + B * out_features)
    cost = pl.CostEstimate(flops=flops, transcendentals=0,
                           bytes_accessed=bytes_accessed)

    if B <= tile_m:
        # Grid-less: tiny problem, single invocation, every operand whole in VMEM.
        return pl.pallas_call(
            kernel,
            out_shape=jax.ShapeDtypeStruct((B, out_features), jnp.float32),
            in_specs=[pl.BlockSpec(memory_space=pltpu.MemorySpace.VMEM)] * n_inputs,
            out_specs=pl.BlockSpec(memory_space=pltpu.MemorySpace.VMEM),
            compiler_params=pltpu.CompilerParams(vmem_limit_bytes=vmem_limit_bytes),
            cost_estimate=cost,
        )(x, *flat_params)

    # Large batch: batch-parallel grid so v7x's second TensorCore gets half the rows.
    in_f = x.shape[1]
    b_pad = _round_up(B, tile_m)
    xp = x if b_pad == B else jnp.zeros((b_pad, in_f), x.dtype).at[:B].set(x)

    in_specs = [pl.BlockSpec((tile_m, in_f), lambda i: (i, 0))]
    for p in flat_params:
        in_specs.append(pl.BlockSpec(p.shape, lambda i: (0, 0)))

    out = pl.pallas_call(
        kernel,
        out_shape=jax.ShapeDtypeStruct((b_pad, out_features), jnp.float32),
        grid=(b_pad // tile_m,),
        in_specs=in_specs,
        out_specs=pl.BlockSpec((tile_m, out_features), lambda i: (i, 0)),
        compiler_params=pltpu.CompilerParams(
            dimension_semantics=("parallel",),
            vmem_limit_bytes=vmem_limit_bytes),
        cost_estimate=cost,
    )(xp, *flat_params)
    return out if b_pad == B else out[:B]


class LinearModelPallas:
    """JAX/Pallas port of LinearModel's fc_blocks (Linear -> ReLU? -> Dropout?), fused."""

    def __init__(self, fc_layers, use_dropout, drop_prob, use_ac_func, key):
        # Same validity checks as LinearModel._check().
        assert isinstance(fc_layers, list) and len(fc_layers) >= 2
        assert len(use_dropout) < len(fc_layers)
        assert len(drop_prob) < len(fc_layers)
        assert len(use_ac_func) < len(fc_layers)
        assert len(drop_prob) == len(use_dropout)

        self.fc_layers = fc_layers
        self.use_dropout = use_dropout
        self.drop_prob = drop_prob
        self.use_ac_func = use_ac_func

        n_layers = len(fc_layers) - 1
        relu_flags = tuple(
            (i < len(use_ac_func)) and bool(use_ac_func[i]) for i in range(n_layers)
        )

        self.torch_params = []   # [out, in] W, [out] b  (PyTorch layout, for reference checks)
        self.flat_params = []    # [K, Npad] W, [1, Npad] b  (kernel layout)
        prev_dim = fc_layers[0]  # layer-0 K is the true in_features (no wrapper pad of x)
        for i in range(n_layers):
            fan_in, fan_out = fc_layers[i], fc_layers[i + 1]
            key, kw, kb = jax.random.split(key, 3)
            bound = 1.0 / (fan_in ** 0.5)
            # nn.Linear default init: U(-1/sqrt(fan_in), 1/sqrt(fan_in)) for W and b.
            w = jax.random.uniform(kw, (fan_out, fan_in), jnp.float32, -bound, bound)
            b = jax.random.uniform(kb, (fan_out,), jnp.float32, -bound, bound)
            self.torch_params.append((w, b))

            # One-time transpose to [K, N] + zero-pad the N dim to a 128 multiple so every
            # intermediate matmul/store is lane-dense. K equals the previous layer's padded
            # width (padded activation lanes are exact zeros, so correctness is preserved).
            out_pad = _round_up(fan_out, 128)
            wp = jnp.zeros((prev_dim, out_pad), jnp.float32).at[:fan_in, :fan_out].set(w.T)
            bp = jnp.zeros((1, out_pad), jnp.float32).at[0, :fan_out].set(b)
            self.flat_params.extend([wp, bp])
            prev_dim = out_pad

        # VMEM budget guard: keep a generous limit but stay well under v7x's 64 MiB physical.
        weight_bytes = sum(int(p.size) * 4 for p in self.flat_params)
        vmem_limit = int(min(max(2 * weight_bytes + (4 << 20), 32 << 20), 48 << 20))
        # TODO(synk): if weight_bytes ever approaches the cap, switch to a K/N-tiled matmul path.

        self._forward = jax.jit(
            functools.partial(
                _fused_mlp_forward,
                relu_flags=relu_flags,
                out_features=fc_layers[-1],
                vmem_limit_bytes=vmem_limit,
            )
        )

    def __call__(self, x):
        return self._forward(x, self.flat_params)


if __name__ == "__main__":
    key = jax.random.PRNGKey(0)
    key, kinit, kx = jax.random.split(key, 3)

    fc_layers = [32, 64, 64, 16]
    use_dropout = [True, True, False]
    drop_prob = [0.5, 0.5, 0.0]
    use_ac_func = [True, True, False]

    model = LinearModelPallas(fc_layers, use_dropout, drop_prob, use_ac_func, kinit)

    batch = 8
    x = jax.random.normal(kx, (batch, fc_layers[0]), jnp.float32)

    out = model(x)
    jax.block_until_ready(out)
    assert out.shape == (batch, fc_layers[-1])

    # Sanity check against a plain-JAX reference (eval-mode MLP, true-f32 matmuls, PyTorch layout).
    ref = x
    for i, (w, b) in enumerate(model.torch_params):
        ref = jnp.dot(ref, w.T, precision=jax.lax.Precision.HIGHEST) + b
        if i < len(use_ac_func) and use_ac_func[i]:
            ref = jnp.maximum(ref, 0.0)
    assert jnp.allclose(out, ref, atol=1e-5, rtol=1e-5), (
        float(jnp.max(jnp.abs(out - ref)))
    )

    print("KERNEL_OK")
</pallas_src>

<mosaic_0001>
module attributes {stable_mosaic.version = 11 : i64} {
  func.func @_fused_mlp_kernel(%arg0: memref<8x32xf32, #tpu.memory_space<vmem>>, %arg1: memref<32x128xf32, #tpu.memory_space<vmem>>, %arg2: memref<1x128xf32, #tpu.memory_space<vmem>>, %arg3: memref<128x128xf32, #tpu.memory_space<vmem>>, %arg4: memref<1x128xf32, #tpu.memory_space<vmem>>, %arg5: memref<128x128xf32, #tpu.memory_space<vmem>>, %arg6: memref<1x128xf32, #tpu.memory_space<vmem>>, %arg7: memref<8x16xf32, #tpu.memory_space<vmem>>) attributes {dimension_semantics = [], scalar_prefetch = 0 : i64, scratch_operands = 0 : i64, tpu.core_type = #tpu.core_type<tc>} {
    %c0 = arith.constant 0 : index
    %c0_0 = arith.constant 0 : index
    %0 = vector.load %arg0[%c0, %c0_0] : memref<8x32xf32, #tpu.memory_space<vmem>>, vector<8x32xf32>
    %c0_1 = arith.constant 0 : index
    %c0_2 = arith.constant 0 : index
    %1 = vector.load %arg1[%c0_1, %c0_2] : memref<32x128xf32, #tpu.memory_space<vmem>>, vector<32x128xf32>
    %c0_3 = arith.constant 0 : index
    %c0_4 = arith.constant 0 : index
    %2 = vector.load %arg2[%c0_3, %c0_4] : memref<1x128xf32, #tpu.memory_space<vmem>>, vector<1x128xf32>
    %cst = arith.constant dense<0.000000e+00> : vector<8x128xf32>
    %3 = tpu.matmul %0, %1, %cst {dimension_numbers = #tpu.dot_dimension_numbers<[1], [0], [0], [1], [0, 0, 1, 1], [], []>, precision = #tpu.contract_precision<fp32>} : vector<8x32xf32>, vector<32x128xf32>, vector<8x128xf32> -> vector<8x128xf32>
    %4 = vector.broadcast %2 : vector<1x128xf32> to vector<8x128xf32>
    %5 = arith.addf %3, %4 : vector<8x128xf32>
    %cst_5 = arith.constant 0.000000e+00 : f32
    %6 = vector.broadcast %cst_5 : f32 to vector<8x128xf32>
    %7 = arith.maximumf %5, %6 : vector<8x128xf32>
    %c0_6 = arith.constant 0 : index
    %c0_7 = arith.constant 0 : index
    %8 = vector.load %arg3[%c0_6, %c0_7] : memref<128x128xf32, #tpu.memory_space<vmem>>, vector<128x128xf32>
    %c0_8 = arith.constant 0 : index
    %c0_9 = arith.constant 0 : index
    %9 = vector.load %arg4[%c0_8, %c0_9] : memref<1x128xf32, #tpu.memory_space<vmem>>, vector<1x128xf32>
    %cst_10 = arith.constant dense<0.000000e+00> : vector<8x128xf32>
    %10 = tpu.matmul %7, %8, %cst_10 {dimension_numbers = #tpu.dot_dimension_numbers<[1], [0], [0], [1], [0, 0, 1, 1], [], []>, precision = #tpu.contract_precision<fp32>} : vector<8x128xf32>, vector<128x128xf32>, vector<8x128xf32> -> vector<8x128xf32>
    %11 = vector.broadcast %9 : vector<1x128xf32> to vector<8x128xf32>
    %12 = arith.addf %10, %11 : vector<8x128xf32>
    %cst_11 = arith.constant 0.000000e+00 : f32
    %13 = vector.broadcast %cst_11 : f32 to vector<8x128xf32>
    %14 = arith.maximumf %12, %13 : vector<8x128xf32>
    %c0_12 = arith.constant 0 : index
    %c0_13 = arith.constant 0 : index
    %15 = vector.load %arg5[%c0_12, %c0_13] : memref<128x128xf32, #tpu.memory_space<vmem>>, vector<128x128xf32>
    %c0_14 = arith.constant 0 : index
    %c0_15 = arith.constant 0 : index
    %16 = vector.load %arg6[%c0_14, %c0_15] : memref<1x128xf32, #tpu.memory_space<vmem>>, vector<1x128xf32>
    %cst_16 = arith.constant dense<0.000000e+00> : vector<8x128xf32>
    %17 = tpu.matmul %14, %15, %cst_16 {dimension_numbers = #tpu.dot_dimension_numbers<[1], [0], [0], [1], [0, 0, 1, 1], [], []>, precision = #tpu.contract_precision<fp32>} : vector<8x128xf32>, vector<128x128xf32>, vector<8x128xf32> -> vector<8x128xf32>
    %18 = vector.broadcast %16 : vector<1x128xf32> to vector<8x128xf32>
    %19 = arith.addf %17, %18 : vector<8x128xf32>
    %20 = vector.extract_strided_slice %19 {offsets = [0, 0], sizes = [8, 16], strides = [1, 1]} : vector<8x128xf32> to vector<8x16xf32>
    %c0_17 = arith.constant 0 : index
    %c0_18 = arith.constant 0 : index
    %21 = vector.load %arg7[%c0_17, %c0_18] : memref<8x16xf32, #tpu.memory_space<vmem>>, vector<8x16xf32>
    tpu.vector_store %arg7[%c0_17, %c0_18], %20 {strides = array<i32>} : memref<8x16xf32, #tpu.memory_space<vmem>>, vector<8x16xf32>,
    return
  }
}

</mosaic_0001>

<bundles_post_ra>
// kernel: _fused_mlp_forward.1
= control target key start
LH: loop header
LB: loop body
LE: loop exit
PB: predicated region body
PF: predicated region fallthrough
CT: control target
= control target key end

     0   :  { %12 = vsyncpa [#allocation3], 0  ;;  %s3651_s0 = inlined_call_operand.hbm [shape: f32[8,32], index: 0, kind: input, shape index: {}]   ;;  %s3652_s1 = inlined_call_operand.hbm [shape: f32[32,128], index: 1, kind: input, shape index: {}]   ;;  %s3653_s2 = inlined_call_operand.vmem [shape: f32[1,128], index: 2, kind: input, shape index: {}]   ;;  %s3654_s3 = inlined_call_operand.hbm [shape: f32[128,128], index: 3, kind: input, shape index: {}]   ;;  %s3655_s4 = inlined_call_operand.vmem [shape: f32[1,128], index: 4, kind: input, shape index: {}]   ;;  %s3656_s5 = inlined_call_operand.hbm [shape: f32[128,128], index: 5, kind: input, shape index: {}]   ;;  %s3657_s6 = inlined_call_operand.vmem [shape: f32[1,128], index: 6, kind: input, shape index: {}]   ;;  %s3658_s7 = inlined_call_operand.hbm [shape: f32[8,16], index: 7, kind: output, shape index: {}]  }
   0x1   :  { %13 = vsyncpa [#allocation6], 0 }
   0x2   :  { %14 = vsyncpa [#allocation9], 0 }
   0x3   :  { %15 = vsyncpa [#allocation4], 0  ;;  %s2770_s24 = smov [#allocation5]  }
   0x4   :  { %s31_s25 = sshll.u32 %s2770_s24, 4  ;;  %s32_s25 = int_to_ptr.vmem [resolvable:$true] %s31_s25 }
   0x5   :  { %s2670_s26 = scalar_lea.vmem %s32_s25, 512  ;;  %p2675_p1 = scmp.lt.s32.totalorder %s32_s25, %s32_s25 }
   0x6   :  { %p2671_p0 = scmp.ne.s32.totalorder %s32_s25, %s2670_s26  ;;  %p2676_p2 = scmp.lt.s32.totalorder %s2670_s26, %s2670_s26 }
   0x8   :  { %p2677_p3 = por %p2676_p2, %p2675_p1 }
   0xa   :  { %p2678_p4 = pnand %p2677_p3, %p2671_p0 }
   0xc   :  { %2681 = shalt.err (!%p2678_p4)
}
   0xd   :  { %s2771_s27 = smov 128   ;;  %s2772_s28 = smov 8  }
   0xe   :  { %37 = dma.hbm_to_vmem [thread:$0]  %s3652_s1, 512, %s32_s25, [#allocation6], %s2771_s27, %s2771_s27, %s2772_s28  }
   0xf   :  { %s2773_s8 = smov [#allocation2]   ;;  %s2774_s10 = smov [#allocation7]  }
  0x10   :  { %s22_s9 = sshll.u32 %s2773_s8, 4  ;;  %s45_s11 = sshll.u32 %s2774_s10, 4  ;;  %s23_s9 = int_to_ptr.vmem [resolvable:$true] %s22_s9  ;;  %s46_s11 = int_to_ptr.vmem [resolvable:$true] %s45_s11 }
  0x11   :  { %s2690_s12 = scalar_lea.vmem %s23_s9, 128  ;;  %p2695_p6 = scmp.lt.s32.totalorder %s23_s9, %s23_s9 }
  0x12   :  { %p2691_p5 = scmp.ne.s32.totalorder %s23_s9, %s2690_s12  ;;  %p2696_p7 = scmp.lt.s32.totalorder %s2690_s12, %s2690_s12 }
  0x14   :  { %p2697_p8 = por %p2696_p7, %p2695_p6 }
  0x16   :  { %p2698_p9 = pnand %p2697_p8, %p2691_p5 }
  0x18   :  { %2701 = shalt.err (!%p2698_p9)
}
  0x19   :  { %25 = dma.hbm_to_vmem [thread:$0]  %s3651_s0, 128, %s23_s9, [#allocation3]  }
  0x1a   :  { %s2710_s15 = scalar_lea.vmem %s46_s11, 2048  ;;  %p2715_p11 = scmp.lt.s32.totalorder %s46_s11, %s46_s11 }
  0x1b   :  { %p2711_p10 = scmp.ne.s32.totalorder %s46_s11, %s2710_s15  ;;  %p2716_p12 = scmp.lt.s32.totalorder %s2710_s15, %s2710_s15 }
  0x1d   :  { %p2717_p13 = por %p2716_p12, %p2715_p11 }
  0x1f   :  { %p2718_p0 = pnand %p2717_p13, %p2711_p10 }
  0x21   :  { %2721 = shalt.err (!%p2718_p0)
}
  0x22   :  { %51 = dma.hbm_to_vmem [thread:$0]  %s3654_s3, 2048, %s46_s11, [#allocation6], %s2771_s27, %s2771_s27, %s2772_s28  }
  0x23   :  { %s2775_s17 = smov [#allocation8]  }
  0x24   :  { %s59_s18 = sshll.u32 %s2775_s17, 4  ;;  %s60_s18 = int_to_ptr.vmem [resolvable:$true] %s59_s18 }
  0x25   :  { %s2730_s19 = scalar_lea.vmem %s60_s18, 2048  ;;  %p2735_p2 = scmp.lt.s32.totalorder %s60_s18, %s60_s18 }
  0x26   :  { %p2731_p1 = scmp.ne.s32.totalorder %s60_s18, %s2730_s19  ;;  %p2736_p3 = scmp.lt.s32.totalorder %s2730_s19, %s2730_s19 }
  0x28   :  { %p2737_p4 = por %p2736_p3, %p2735_p2 }
  0x2a   :  { %p2738_p5 = pnand %p2737_p4, %p2731_p1 }
  0x2c   :  { %2741 = shalt.err (!%p2738_p5)
}
  0x2d   :  { %65 = dma.hbm_to_vmem [thread:$0]  %s3656_s5, 2048, %s60_s18, [#allocation9], %s2771_s27, %s2771_s27, %s2772_s28  }
  0x2e   :  { %2762 = dma.done.wait [#allocation3], 128  }
  0x2f   :  { %2763 = vsyncadd [#allocation3], 4294967168 }
  0x30   :  { %2764 = dma.done.wait [#allocation6], 2560  }
  0x31   :  { %2765 = vsyncadd [#allocation6], 4294964736 }
  0x32   :  { %2766 = dma.done.wait [#allocation9], 2048  }
  0x33   :  { %2767 = vsyncadd [#allocation9], 4294965248  ;;  %v2776_v0 = vmov 0.0   ;;  %vm2777_vm0 = vmmov 0   ;;  %vm92_vm1 = vcmask 261120   ;;  %v84_v1 = vld [vmem:[#allocation5 + $0x18] sm:$0xff] }
  0x34   :  { %2167 = vmatprep.subr.mxu0 %v2776_v0  ;;  %2178 = vmatprep.subr.mxu1 %v2776_v0  ;;  %v83_v2 = vld [vmem:[#allocation5 + $0x10] sm:$0xff]  ;;  %v82_v3 = vld [vmem:[#allocation5 + $0x8] sm:$0xff]  ;;  %v2846_v4 = vand.u32 4294901760, %v84_v1  ;;  %v81_v7 = vld [vmem:[#allocation5] sm:$0xff]  ;;  %s2778_s23 = smov [#allocation10]   ;;  %vm1911_vm2 = vcmask 130048  }
  0x35   :  { %2175 = vmatprep.mubr.msk.f32.mxu0 %vm2777_vm0, %v2776_v0  ;;  %2186 = vmatprep.mubr.msk.f32.mxu1 %vm2777_vm0, %v2776_v0  ;;  %v2848_v5 = vand.u32 4294901760, %v83_v2  ;;  %v2850_v6 = vand.u32 4294901760, %v82_v3  ;;  %v80_v8 = vld [vmem:[#allocation2] sm:$0xff]  ;;  %v2852_v9 = vand.u32 4294901760, %v81_v7  ;;  %v596_v33 = vld [vmem:[#allocation7 + $0x70] sm:$0xff]  ;;  %v595_v35 = vld [vmem:[#allocation7 + $0x68] sm:$0xff] }
  0x36   :  { %v94_v10 = vsel %vm92_vm1, %v80_v8, 0  ;;  %2168 = vmatpush3.msra.mxu0 %v2846_v4  ;;  %v201_v11 = vsub.f32 %v84_v1, %v2846_v4  ;;  %v597_v32 = vld [vmem:[#allocation7 + $0x78] sm:$0xff]  ;;  %v2897_v36 = vand.u32 4294901760, %v596_v33  ;;  %v2905_v38 = vand.u32 4294901760, %v595_v35  ;;  %v594_v50 = vld [vmem:[#allocation7 + $0x60] sm:$0xff]  ;;  %v592_v55 = vld [vmem:[#allocation7 + $0x50] sm:$0xff] }
  0x37   :  { %v2856_v12 = vand.u32 4294901760, %v94_v10  ;;  %v208_v13 = vsub.f32 %v83_v2, %v2848_v5  ;;  %v2860_v14 = vsub.f32 %v82_v3, %v2850_v6  ;;  %2169 = vmatprep.subr.mxu0 %v2776_v0  ;;  %v2864_v15 = vsub.f32 %v81_v7, %v2852_v9  ;;  %v593_v52 = vld [vmem:[#allocation7 + $0x58] sm:$0xff]  ;;  %v591_v59 = vld [vmem:[#allocation7 + $0x48] sm:$0xff]  ;;  %v590_v1 = vld [vmem:[#allocation7 + $0x40] sm:$0xff]  ;;  %s1919_s24 = sshll.u32 %s2778_s23, 4  ;;  %s1920_s24 = int_to_ptr.vmem [resolvable:$true] %s1919_s24 }
  0x38   :  { %2170 = vmatpush3.msra.mxu0 %v2848_v5  ;;  %v202_v16 = vand.u32 4294901760, %v201_v11  ;;  %v2890_v34 = vand.u32 4294901760, %v597_v32  ;;  %v2911_v39 = vsub.f32 %v596_v33, %v2897_v36  ;;  %v2920_v41 = vsub.f32 %v595_v35, %v2905_v38  ;;  %v589_v7 = vld [vmem:[#allocation7 + $0x38] sm:$0xff]  ;;  %s2742_s25 = scalar_lea.vmem %s1920_s24, 128  ;;  %p2747_p7 = scmp.lt.s32.totalorder %s1920_s24, %s1920_s24 }
  0x39   :  { %v2868_v17 = vsub.f32 %v94_v10, %v2856_v12  ;;  %v209_v18 = vand.u32 4294901760, %v208_v13  ;;  %v216_v19 = vand.u32 4294901760, %v2860_v14  ;;  %2171 = vmatprep.subr.mxu0 %v2776_v0  ;;  %v223_v20 = vand.u32 4294901760, %v2864_v15  ;;  %p2743_p6 = scmp.ne.s32.totalorder %s1920_s24, %s2742_s25  ;;  %p2748_p8 = scmp.lt.s32.totalorder %s2742_s25, %s2742_s25 }
  0x3a   :  { %2172 = vmatpush3.msra.mxu0 %v2850_v6  ;;  %v203_v21 = vsub.f32 %v201_v11, %v202_v16  ;;  %v2903_v37 = vsub.f32 %v597_v32, %v2890_v34  ;;  %v706_v42 = vand.u32 4294901760, %v2911_v39  ;;  %v713_v44 = vand.u32 4294901760, %v2920_v41 }
  0x3b   :  { %v167_v22 = vand.u32 4294901760, %v2868_v17  ;;  %v210_v23 = vsub.f32 %v208_v13, %v209_v18  ;;  %v217_v24 = vsub.f32 %v2860_v14, %v216_v19  ;;  %2173 = vmatprep.subr.mxu0 %v2776_v0  ;;  %v224_v28 = vsub.f32 %v2864_v15, %v223_v20  ;;  %p2749_p9 = por %p2748_p8, %p2747_p7 }
  0x3c   :  { %2174 = vmatpush3.msra.mxu0 %v2852_v9  ;;  %v204_v25 = vand.u32 4294901760, %v203_v21  ;;  %v699_v40 = vand.u32 4294901760, %v2903_v37  ;;  %v707_v45 = vsub.f32 %v2911_v39, %v706_v42  ;;  %v714_v47 = vsub.f32 %v2920_v41, %v713_v44 }
  0x3d   :  { %v168_v26 = vsub.f32 %v2868_v17, %v167_v22  ;;  %v211_v27 = vand.u32 4294901760, %v210_v23  ;;  %2189 = vmatprep.subr.mxu0 %v2776_v0  ;;  %v218_v30 = vand.u32 4294901760, %v217_v24  ;;  %v225_v31 = vand.u32 4294901760, %v224_v28  ;;  %p2750_p10 = pnand %p2749_p9, %p2743_p6 }
  0x3e   :  { %2179 = vmatpush3.msra.mxu1 %v204_v25  ;;  %v700_v43 = vsub.f32 %v2903_v37, %v699_v40  ;;  %v708_v48 = vand.u32 4294901760, %v707_v45  ;;  %v715_v49 = vand.u32 4294901760, %v714_v47  ;;  %v2963_v51 = vand.u32 4294901760, %v594_v50  ;;  %v586_v25 = vld [vmem:[#allocation7 + $0x20] sm:$0xff] }
  0x3f   :  { %v169_v29 = vand.u32 4294901760, %v168_v26  ;;  %2180 = vmatprep.subr.mxu1 %v2776_v0  ;;  %v2968_v54 = vand.u32 4294901760, %v593_v52  ;;  %v2976_v58 = vand.u32 4294901760, %v592_v55  ;;  %v2987_v63 = vand.u32 4294901760, %v591_v59 }
  0x40   :  { %2181 = vmatpush3.msra.mxu1 %v211_v27  ;;  %v701_v46 = vand.u32 4294901760, %v700_v43  ;;  %v2966_v53 = vsub.f32 %v594_v50, %v2963_v51 }
  0x41   :  { %2176 = vmatmul.mubr.f32.vlgmr.msra.gmra.mxu0 %v169_v29  ;;  %2182 = vmatprep.subr.mxu1 %v2776_v0  ;;  %v2974_v57 = vsub.f32 %v593_v52, %v2968_v54  ;;  %v2985_v62 = vsub.f32 %v592_v55, %v2976_v58  ;;  %v3044_v29 = vand.u32 4294901760, %v586_v25  ;;  %v583_v55 = vld [vmem:[#allocation7 + $0x8] sm:$0xff] }
  0x42   :  { %2190 = vmatpush3.msra.mxu0 %v201_v11  ;;  %2183 = vmatpush3.msra.mxu1 %v218_v30  ;;  %v720_v56 = vand.u32 4294901760, %v2966_v53  ;;  %v3006_v11 = vand.u32 4294901760, %v589_v7 }
  0x43   :  { %2191 = vmatprep.subr.mxu0 %v2776_v0  ;;  %2184 = vmatprep.subr.mxu1 %v2776_v0  ;;  %v727_v61 = vand.u32 4294901760, %v2974_v57  ;;  %v3054_v43 = vsub.f32 %v586_v25, %v3044_v29 }
  0x44   :  { %2192 = vmatpush3.msra.mxu0 %v208_v13  ;;  %2185 = vmatpush3.msra.mxu1 %v225_v31  ;;  %v721_v60 = vsub.f32 %v2966_v53, %v720_v56  ;;  %v588_v13 = vld [vmem:[#allocation7 + $0x30] sm:$0xff]  ;;  %v585_v31 = vld [vmem:[#allocation7 + $0x18] sm:$0xff] }
  0x45   :  { %2193 = vmatprep.subr.mxu0 %v2776_v0  ;;  %2187 = vmatmul.mubr.f32.vlgmr.msra.gmra.mxu1 %v2856_v12  ;;  %v728_v3 = vsub.f32 %v2974_v57, %v727_v61  ;;  %v3057_v45 = vand.u32 4294901760, %v585_v31 }
  0x46   :  { %2194 = vmatpush3.msra.mxu0 %v2860_v14  ;;  %2200 = vmatprep.subr.mxu1 %v2776_v0  ;;  %v722_v2 = vand.u32 4294901760, %v721_v60 }
  0x47   :  { %2195 = vmatprep.subr.mxu0 %v2776_v0  ;;  %2201 = vmatpush3.msra.mxu1 %v2846_v4  ;;  %v729_v8 = vand.u32 4294901760, %v728_v3  ;;  %v3069_v52 = vsub.f32 %v585_v31, %v3057_v45 }
  0x48   :  { %2196 = vmatpush3.msra.mxu0 %v2864_v15  ;;  %2197 = vmatprep.mubr.msk.f32.mxu0 %vm2777_vm0, %v2776_v0 }
  0x49   :  { %2202 = vmatprep.subr.mxu1 %v2776_v0  ;;  %2211 = vmatprep.subr.mxu0 %v2776_v0  ;;  %v3662_v3 = vand.u32 4294901760, %v3069_v52 }
  0x4a   :  { %2198 = vmatmul.mubr.f32.vlgmr.msra.gmra.mxu0 %v2868_v17  ;;  %2203 = vmatpush3.msra.mxu1 %v2848_v5  ;;  %v3019_v17 = vand.u32 4294901760, %v588_v13 }
  0x4b   :  { %2212 = vmatpush3.msra.mxu0 %v202_v16  ;;  %2204 = vmatprep.subr.mxu1 %v2776_v0  ;;  %v3017_v16 = vsub.f32 %v589_v7, %v3006_v11  ;;  %v582_v7 = vld [vmem:[#allocation7] sm:$0xff] }
  0x4c   :  { %2213 = vmatprep.subr.mxu0 %v2776_v0  ;;  %2205 = vmatpush3.msra.mxu1 %v2850_v6 }
  0x4d   :  { %2214 = vmatpush3.msra.mxu0 %v209_v18  ;;  %2206 = vmatprep.subr.mxu1 %v2776_v0  ;;  %v755_v21 = vand.u32 4294901760, %v3017_v16 }
  0x4e   :  { %2215 = vmatprep.subr.mxu0 %v2776_v0  ;;  %2207 = vmatpush3.msra.mxu1 %v2852_v9 }
  0x4f   :  { %2208 = vmatprep.mubr.msk.f32.mxu1 %vm2777_vm0, %v2776_v0  ;;  %2216 = vmatpush3.msra.mxu0 %v216_v19  ;;  %v587_v19 = vld [vmem:[#allocation7 + $0x28] sm:$0xff]  ;;  %v756_v26 = vsub.f32 %v3017_v16, %v755_v21 }
  0x50   :  { %2209 = vmatmul.mubr.f32.vlgmr.msra.gmra.mxu1 %v167_v22  ;;  %2217 = vmatprep.subr.mxu0 %v2776_v0  ;;  %v3027_v22 = vsub.f32 %v588_v13, %v3019_v17  ;;  %v3029_v23 = vand.u32 4294901760, %v587_v19 }
  0x51   :  { %2222 = vmatprep.subr.mxu1 %v2776_v0  ;;  %2218 = vmatpush3.msra.mxu0 %v223_v20  ;;  %v757_v32 = vand.u32 4294901760, %v756_v26 }
  0x52   :  { %2219 = vmatprep.mubr.msk.f32.mxu0 %vm2777_vm0, %v2776_v0  ;;  %2223 = vmatpush3.msra.mxu1 %v2846_v4  ;;  %v734_v4 = vand.u32 4294901760, %v2985_v62  ;;  %v762_v27 = vand.u32 4294901760, %v3027_v22  ;;  %v3042_v28 = vsub.f32 %v587_v19, %v3029_v23 }
  0x53   :  { %2220 = vmatmul.mubr.f32.vlgmr.msra.gmra.mxu0 %v2856_v12  ;;  %2224 = vmatprep.subr.mxu1 %v2776_v0 }
  0x54   :  { %2230 = vmatprep.mubr.msk.f32.mxu1 %vm2777_vm0, %v2776_v0  ;;  %2225 = vmatpush3.msra.mxu1 %v2848_v5  ;;  %v2996_v5 = vsub.f32 %v591_v59, %v2987_v63  ;;  %v763_v33 = vsub.f32 %v3027_v22, %v762_v27  ;;  %v3664_v35 = vand.u32 4294901760, %v3042_v28 }
  0x55   :  { %2233 = vmatprep.subr.mxu0 %v2776_v0  ;;  %2226 = vmatprep.subr.mxu1 %v2776_v0 }
  0x56   :  { %2234 = vmatpush3.msra.mxu0 %v2890_v34  ;;  %2227 = vmatpush3.msra.mxu1 %v2850_v6  ;;  %v2999_v6 = vand.u32 4294901760, %v590_v1  ;;  %v741_v10 = vand.u32 4294901760, %v2996_v5  ;;  %v764_v47 = vand.u32 4294901760, %v763_v33 }
  0x57   :  { %2235 = vmatprep.subr.mxu0 %v2776_v0  ;;  %2228 = vmatprep.subr.mxu1 %v2776_v0 }
  0x58   :  { %2236 = vmatpush3.msra.mxu0 %v2897_v36  ;;  %2229 = vmatpush3.msra.mxu1 %v2852_v9  ;;  %v735_v9 = vsub.f32 %v2985_v62, %v734_v4  ;;  %v742_v15 = vsub.f32 %v2996_v5, %v741_v10 }
  0x59   :  { %2237 = vmatprep.subr.mxu0 %v2776_v0  ;;  %2231 = vmatmul.mubr.f32.vlgmr.msra.gmra.mxu1 %v2856_v12  ;;  %v3010_v12 = vsub.f32 %v590_v1, %v2999_v6 }
  0x5a   :  { %2268 = vmatprep.subr.mxu1 %v2776_v0  ;;  %2238 = vmatpush3.msra.mxu0 %v2905_v38  ;;  %v736_v14 = vand.u32 4294901760, %v735_v9  ;;  %v743_v20 = vand.u32 4294901760, %v742_v15  ;;  %v784_v15 = vsub.f32 %v3069_v52, %v3662_v3 }
  0x5b   :  { %2269 = vmatpush3.msra.mxu1 %v701_v46  ;;  %2239 = vmatprep.subr.mxu0 %v2776_v0  ;;  %v748_v18 = vand.u32 4294901760, %v3010_v12  ;;  %v584_v46 = vld [vmem:[#allocation7 + $0x10] sm:$0xff] }
  0x5c   :  { %2270 = vmatprep.subr.mxu1 %v2776_v0  ;;  %2300 = vmatprep.mubr.msk.f32.mxu1 %vm2777_vm0, %v2776_v0  ;;  %v3065_v50 = vand.u32 4294901760, %v584_v46  ;;  %v785_v25 = vand.u32 4294901760, %v784_v15 }
  0x5d   :  { %2271 = vmatpush3.msra.mxu1 %v708_v48  ;;  %2265 = vmatprep.mubr.msk.f32.mxu0 %vm2777_vm0, %v2776_v0  ;;  %v749_v24 = vsub.f32 %v3010_v12, %v748_v18  ;;  %v770_v48 = vsub.f32 %v3042_v28, %v3664_v35 }
  0x5e   :  { %2272 = vmatprep.subr.mxu1 %v2776_v0  ;;  %2240 = vmatpush3.msra.mxu0 %v2963_v51  ;;  %v3077_v1 = vsub.f32 %v584_v46, %v3065_v50 }
  0x5f   :  { %2273 = vmatpush3.msra.mxu1 %v715_v49  ;;  %2241 = vmatprep.subr.mxu0 %v2776_v0  ;;  %v750_v30 = vand.u32 4294901760, %v749_v24  ;;  %v3663_v49 = vand.u32 4294901760, %v3054_v43  ;;  %v771_v59 = vand.u32 4294901760, %v770_v48 }
  0x60   :  { %2274 = vmatprep.subr.mxu1 %v2776_v0  ;;  %2242 = vmatpush3.msra.mxu0 %v2968_v54  ;;  %v3661_v9 = vand.u32 4294901760, %v3077_v1 }
  0x61   :  { %2243 = vmatprep.subr.mxu0 %v2776_v0  ;;  %2275 = vmatpush3.msra.mxu1 %v722_v2  ;;  %v777_v60 = vsub.f32 %v3054_v43, %v3663_v49  ;;  %v3079_v2 = vand.u32 4294901760, %v583_v55 }
  0x62   :  { %2244 = vmatpush3.msra.mxu0 %v2976_v58  ;;  %2276 = vmatprep.subr.mxu1 %v2776_v0  ;;  %v791_v19 = vsub.f32 %v3077_v1, %v3661_v9 }
  0x63   :  { %2245 = vmatprep.subr.mxu0 %v2776_v0  ;;  %2277 = vmatpush3.msra.mxu1 %v729_v8  ;;  %v778_v8 = vand.u32 4294901760, %v777_v60  ;;  %v3087_v13 = vsub.f32 %v583_v55, %v3079_v2 }
  0x64   :  { %2246 = vmatpush3.msra.mxu0 %v2987_v63  ;;  %2278 = vmatprep.subr.mxu1 %v2776_v0  ;;  %v792_v26 = vand.u32 4294901760, %v791_v19 }
  0x65   :  { %2247 = vmatprep.subr.mxu0 %v2776_v0  ;;  %2279 = vmatpush3.msra.mxu1 %v736_v14  ;;  %v3089_v14 = vand.u32 4294901760, %v582_v7 }
  0x66   :  { %2248 = vmatpush3.msra.mxu0 %v2999_v6  ;;  %2280 = vmatprep.subr.mxu1 %v2776_v0 }
  0x67   :  { %2249 = vmatprep.subr.mxu0 %v2776_v0  ;;  %2281 = vmatpush3.msra.mxu1 %v743_v20  ;;  %v3660_v20 = vand.u32 4294901760, %v3087_v13  ;;  %v3102_v24 = vsub.f32 %v582_v7, %v3089_v14 }
  0x68   :  { %2250 = vmatpush3.msra.mxu0 %v3006_v11  ;;  %2282 = vmatprep.subr.mxu1 %v2776_v0 }
  0x69   :  { %2251 = vmatprep.subr.mxu0 %v2776_v0  ;;  %2283 = vmatpush3.msra.mxu1 %v750_v30  ;;  %v798_v30 = vsub.f32 %v3087_v13, %v3660_v20  ;;  %v3659_v31 = vand.u32 4294901760, %v3102_v24 }
  0x6a   :  { %2252 = vmatpush3.msra.mxu0 %v3019_v17  ;;  %2284 = vmatprep.subr.mxu1 %v2776_v0 }
  0x6b   :  { %2253 = vmatprep.subr.mxu0 %v2776_v0  ;;  %2285 = vmatpush3.msra.mxu1 %v757_v32  ;;  %v799_v32 = vand.u32 4294901760, %v798_v30  ;;  %v805_v33 = vsub.f32 %v3102_v24, %v3659_v31 }
  0x6c   :  { %2254 = vmatpush3.msra.mxu0 %v3029_v23  ;;  %2286 = vmatprep.subr.mxu1 %v2776_v0 }
  0x6d   :  { %2255 = vmatprep.subr.mxu0 %v2776_v0  ;;  %2287 = vmatpush3.msra.mxu1 %v764_v47  ;;  %v806_v46 = vand.u32 4294901760, %v805_v33 }
  0x6e   :  { %2256 = vmatpush3.msra.mxu0 %v3044_v29  ;;  %2288 = vmatprep.subr.mxu1 %v2776_v0 }
  0x6f   :  { %2257 = vmatprep.subr.mxu0 %v2776_v0  ;;  %2289 = vmatpush3.msra.mxu1 %v771_v59  ;;  %v1930_v59 = vld [vmem:[%s3653_s2] ss:$0 sm:$0xff] }
  0x70   :  { %2258 = vmatpush3.msra.mxu0 %v3057_v45  ;;  %2290 = vmatprep.subr.mxu1 %v2776_v0 }
  0x71   :  { %2259 = vmatprep.subr.mxu0 %v2776_v0  ;;  %2291 = vmatpush3.msra.mxu1 %v778_v8 }
  0x72   :  { %2260 = vmatpush3.msra.mxu0 %v3065_v50  ;;  %2292 = vmatprep.subr.mxu1 %v2776_v0 }
  0x73   :  { %2261 = vmatprep.subr.mxu0 %v2776_v0  ;;  %2293 = vmatpush3.msra.mxu1 %v785_v25 }
  0x74   :  { %2262 = vmatpush3.msra.mxu0 %v3079_v2  ;;  %2294 = vmatprep.subr.mxu1 %v2776_v0 }
  0x75   :  { %2263 = vmatprep.subr.mxu0 %v2776_v0  ;;  %2295 = vmatpush3.msra.mxu1 %v792_v26 }
  0x76   :  { %2264 = vmatpush3.msra.mxu0 %v3089_v14  ;;  %2296 = vmatprep.subr.mxu1 %v2776_v0 }
  0x77   :  { %2303 = vmatprep.subr.mxu0 %v2776_v0  ;;  %2297 = vmatpush3.msra.mxu1 %v799_v32 }
  0x78   :  { %2298 = vmatprep.subr.mxu1 %v2776_v0 }
  0x79   :  { %2299 = vmatpush3.msra.mxu1 %v806_v46 }
  0x7a   :  { %2338 = vmatprep.subr.mxu1 %v2776_v0 }
 0x101   :  { %v171_v47 = vpop.f32.mrf.mxu0 }
 0x102   :  { %v172_v8 = vadd.f32 %v1930_v59, %v171_v47 }
 0x103   :  { %v2177_v48 = vpop.f32.mrf.mxu0 }
 0x105   :  { %v262_v55 = vpop.f32.mrf.mxu1 }
 0x106   :  { %v263_v19 = vadd.f32 %v262_v55, %v172_v8  ;;  %v1254_v8 = vld [vmem:[#allocation8 + $0x38] sm:$0xff] }
 0x107   :  { %v2188_v60 = vpop.f32.mrf.mxu1 }
 0x10a   :  { %v342_v7 = vpop.f32.mrf.mxu0 }
 0x10b   :  { %v343_v30 = vadd.f32 %v342_v7, %v263_v19 }
 0x10c   :  { %v2199_v15 = vpop.f32.mrf.mxu0 }
 0x110   :  { %v419_v25 = vpop.f32.mrf.mxu1 }
 0x111   :  { %v420_v33 = vadd.f32 %v419_v25, %v343_v30  ;;  %v3378_v25 = vand.u32 4294901760, %v1254_v8 }
 0x112   :  { %v2210_v26 = vpop.f32.mrf.mxu1 }
 0x113   :  { %v502_v32 = vpop.f32.mrf.mxu0  ;;  %v1253_v26 = vld [vmem:[#allocation8 + $0x30] sm:$0xff] }
 0x114   :  { %v503_v31 = vadd.f32 %v502_v32, %v420_v33  ;;  %v3384_v32 = vsub.f32 %v1254_v8, %v3378_v25  ;;  %v3386_v33 = vand.u32 4294901760, %v1253_v26 }
 0x115   :  { %v2221_v46 = vpop.f32.mrf.mxu0 }
 0x116   :  { %v1252_v46 = vld [vmem:[#allocation8 + $0x28] sm:$0xff] }
 0x119   :  { %v577_v20 = vpop.f32.mrf.mxu1 }
 0x11a   :  { %v578_v9 = vadd.f32 %v577_v20, %v503_v31 }
 0x11b   :  { %v2232_v48 = vpop.f32.mrf.mxu1 }
 0x11c   :  { %v581_v3 = vmax.f32 %v578_v9, 0.0 }
 0x11e   :  { %v3122_v49 = vand.u32 4294901760, %v581_v3 }
 0x120   :  { %v3125_v35 = vsub.f32 %v581_v3, %v3122_v49  ;;  %2301 = vmatmul.mubr.f32.vlgmr.msra.gmra.mxu1 %v3122_v49 }
 0x121   :  { %2339 = vmatpush3.msra.mxu1 %v2890_v34  ;;  %2370 = vmatprep.mubr.msk.f32.mxu1 %vm2777_vm0, %v2776_v0 }
 0x122   :  { %v688_v47 = vand.u32 4294901760, %v3125_v35  ;;  %2340 = vmatprep.subr.mxu1 %v2776_v0 }
 0x123   :  { %2341 = vmatpush3.msra.mxu1 %v2897_v36 }
 0x124   :  { %v689_v9 = vsub.f32 %v3125_v35, %v688_v47  ;;  %2342 = vmatprep.subr.mxu1 %v2776_v0 }
 0x125   :  { %2343 = vmatpush3.msra.mxu1 %v2905_v38 }
 0x126   :  { %2344 = vmatprep.subr.mxu1 %v2776_v0  ;;  %v690_v3 = vand.u32 4294901760, %v689_v9  ;;  %v3393_v9 = vsub.f32 %v1253_v26, %v3386_v33 }
 0x127   :  { %2345 = vmatpush3.msra.mxu1 %v2963_v51 }
 0x128   :  { %2346 = vmatprep.subr.mxu1 %v2776_v0  ;;  %2266 = vmatmul.mubr.f32.vlgmr.msra.gmra.mxu0 %v690_v3  ;;  %v3395_v3 = vand.u32 4294901760, %v1252_v46 }
 0x129   :  { %2304 = vmatpush3.msra.mxu0 %v2903_v37  ;;  %2347 = vmatpush3.msra.mxu1 %v2968_v54  ;;  %v3671_v37 = vand.u32 4294901760, %v3069_v52 }
 0x12a   :  { %2305 = vmatprep.subr.mxu0 %v2776_v0  ;;  %2348 = vmatprep.subr.mxu1 %v2776_v0 }
 0x12b   :  { %2306 = vmatpush3.msra.mxu0 %v2911_v39  ;;  %2349 = vmatpush3.msra.mxu1 %v2976_v58  ;;  %v3673_v39 = vand.u32 4294901760, %v3087_v13 }
 0x12c   :  { %2307 = vmatprep.subr.mxu0 %v2776_v0  ;;  %2350 = vmatprep.subr.mxu1 %v2776_v0 }
 0x12d   :  { %2308 = vmatpush3.msra.mxu0 %v2920_v41  ;;  %2351 = vmatpush3.msra.mxu1 %v2987_v63  ;;  %v1262_v41 = vld [vmem:[#allocation8 + $0x78] sm:$0xff] }
 0x12e   :  { %2309 = vmatprep.subr.mxu0 %v2776_v0  ;;  %2352 = vmatprep.subr.mxu1 %v2776_v0 }
 0x12f   :  { %2310 = vmatpush3.msra.mxu0 %v2966_v53  ;;  %2353 = vmatpush3.msra.mxu1 %v2999_v6 }
 0x130   :  { %2311 = vmatprep.subr.mxu0 %v2776_v0  ;;  %2354 = vmatprep.subr.mxu1 %v2776_v0 }
 0x131   :  { %2312 = vmatpush3.msra.mxu0 %v2974_v57  ;;  %2355 = vmatpush3.msra.mxu1 %v3006_v11  ;;  %v1258_v57 = vld [vmem:[#allocation8 + $0x58] sm:$0xff] }
 0x132   :  { %2313 = vmatprep.subr.mxu0 %v2776_v0  ;;  %2356 = vmatprep.subr.mxu1 %v2776_v0 }
 0x133   :  { %2314 = vmatpush3.msra.mxu0 %v2985_v62  ;;  %2357 = vmatpush3.msra.mxu1 %v3019_v17  ;;  %v3301_v62 = vand.u32 4294901760, %v1258_v57 }
 0x134   :  { %2315 = vmatprep.subr.mxu0 %v2776_v0  ;;  %2358 = vmatprep.subr.mxu1 %v2776_v0 }
 0x135   :  { %2316 = vmatpush3.msra.mxu0 %v2996_v5  ;;  %2359 = vmatpush3.msra.mxu1 %v3029_v23  ;;  %v1255_v5 = vld [vmem:[#allocation8 + $0x40] sm:$0xff] }
 0x136   :  { %2317 = vmatprep.subr.mxu0 %v2776_v0  ;;  %2360 = vmatprep.subr.mxu1 %v2776_v0 }
 0x137   :  { %2318 = vmatpush3.msra.mxu0 %v3010_v12  ;;  %2361 = vmatpush3.msra.mxu1 %v3044_v29 }
 0x138   :  { %2319 = vmatprep.subr.mxu0 %v2776_v0  ;;  %2362 = vmatprep.subr.mxu1 %v2776_v0 }
 0x139   :  { %2320 = vmatpush3.msra.mxu0 %v3017_v16  ;;  %2363 = vmatpush3.msra.mxu1 %v3057_v45 }
 0x13a   :  { %2321 = vmatprep.subr.mxu0 %v2776_v0  ;;  %2364 = vmatprep.subr.mxu1 %v2776_v0 }
 0x13b   :  { %2322 = vmatpush3.msra.mxu0 %v3027_v22  ;;  %2365 = vmatpush3.msra.mxu1 %v3065_v50 }
 0x13c   :  { %2323 = vmatprep.subr.mxu0 %v2776_v0  ;;  %2366 = vmatprep.subr.mxu1 %v2776_v0 }
 0x13d   :  { %2324 = vmatpush3.msra.mxu0 %v3042_v28  ;;  %2367 = vmatpush3.msra.mxu1 %v3079_v2 }
 0x13e   :  { %2325 = vmatprep.subr.mxu0 %v2776_v0  ;;  %2368 = vmatprep.subr.mxu1 %v2776_v0 }
 0x13f   :  { %2326 = vmatpush3.msra.mxu0 %v3054_v43  ;;  %2369 = vmatpush3.msra.mxu1 %v3089_v14 }
 0x140   :  { %2327 = vmatprep.subr.mxu0 %v2776_v0  ;;  %2371 = vmatmul.mubr.f32.vlgmr.msra.gmra.mxu1 %v688_v47  ;;  %v1420_v47 = vand.u32 4294901760, %v3384_v32 }
 0x141   :  { %2408 = vmatprep.subr.mxu1 %v2776_v0  ;;  %2328 = vmatpush3.msra.mxu0 %v3069_v52 }
 0x142   :  { %2409 = vmatpush3.msra.mxu1 %v2890_v34  ;;  %2329 = vmatprep.subr.mxu0 %v2776_v0  ;;  %v3669_v34 = vand.u32 4294901760, %v3042_v28 }
 0x143   :  { %2410 = vmatprep.subr.mxu1 %v2776_v0  ;;  %2330 = vmatpush3.msra.mxu0 %v3077_v1 }
 0x144   :  { %2411 = vmatpush3.msra.mxu1 %v2897_v36  ;;  %2331 = vmatprep.subr.mxu0 %v2776_v0  ;;  %v3670_v36 = vand.u32 4294901760, %v3054_v43 }
 0x145   :  { %2412 = vmatprep.subr.mxu1 %v2776_v0  ;;  %2332 = vmatpush3.msra.mxu0 %v3087_v13 }
 0x146   :  { %2413 = vmatpush3.msra.mxu1 %v2905_v38  ;;  %2333 = vmatprep.subr.mxu0 %v2776_v0  ;;  %v3672_v38 = vand.u32 4294901760, %v3077_v1 }
 0x147   :  { %2414 = vmatprep.subr.mxu1 %v2776_v0  ;;  %2334 = vmatpush3.msra.mxu0 %v3102_v24 }
 0x148   :  { %2335 = vmatprep.mubr.msk.f32.mxu0 %vm2777_vm0, %v2776_v0  ;;  %2415 = vmatpush3.msra.mxu1 %v2963_v51 }
 0x149   :  { %2336 = vmatmul.mubr.f32.vlgmr.msra.gmra.mxu0 %v3125_v35  ;;  %2373 = vmatprep.subr.mxu0 %v2776_v0 }
 0x14a   :  { %2416 = vmatprep.subr.mxu1 %v2776_v0  ;;  %2374 = vmatpush3.msra.mxu0 %v699_v40  ;;  %v3674_v40 = vand.u32 4294901760, %v3102_v24 }
 0x14b   :  { %2417 = vmatpush3.msra.mxu1 %v2968_v54  ;;  %2375 = vmatprep.subr.mxu0 %v2776_v0  ;;  %v1260_v54 = vld [vmem:[#allocation8 + $0x68] sm:$0xff] }
 0x14c   :  { %2418 = vmatprep.subr.mxu1 %v2776_v0  ;;  %2376 = vmatpush3.msra.mxu0 %v706_v42  ;;  %v3289_v42 = vand.u32 4294901760, %v1262_v41 }
 0x14d   :  { %2419 = vmatpush3.msra.mxu1 %v2976_v58  ;;  %2377 = vmatprep.subr.mxu0 %v2776_v0  ;;  %v3297_v58 = vand.u32 4294901760, %v1260_v54 }
 0x14e   :  { %2420 = vmatprep.subr.mxu1 %v2776_v0  ;;  %2378 = vmatpush3.msra.mxu0 %v713_v44  ;;  %v1261_v44 = vld [vmem:[#allocation8 + $0x70] sm:$0xff]  ;;  %v3292_v51 = vsub.f32 %v1262_v41, %v3289_v42 }
 0x14f   :  { %2421 = vmatpush3.msra.mxu1 %v2987_v63  ;;  %2379 = vmatprep.subr.mxu0 %v2776_v0  ;;  %v3294_v53 = vand.u32 4294901760, %v1261_v44  ;;  %v1257_v63 = vld [vmem:[#allocation8 + $0x50] sm:$0xff]  ;;  %v3314_v16 = vsub.f32 %v1260_v54, %v3297_v58 }
 0x150   :  { %2422 = vmatprep.subr.mxu1 %v2776_v0  ;;  %2380 = vmatpush3.msra.mxu0 %v720_v56  ;;  %v1259_v56 = vld [vmem:[#allocation8 + $0x60] sm:$0xff] }
 0x151   :  { %2423 = vmatpush3.msra.mxu1 %v2999_v6  ;;  %2381 = vmatprep.subr.mxu0 %v2776_v0  ;;  %v1364_v6 = vand.u32 4294901760, %v3292_v51 }
 0x152   :  { %2424 = vmatprep.subr.mxu1 %v2776_v0  ;;  %2382 = vmatpush3.msra.mxu0 %v727_v61  ;;  %v3299_v61 = vand.u32 4294901760, %v1259_v56 }
 0x153   :  { %2425 = vmatpush3.msra.mxu1 %v3006_v11  ;;  %2383 = vmatprep.subr.mxu0 %v2776_v0  ;;  %v3309_v11 = vand.u32 4294901760, %v1257_v63  ;;  %v1365_v22 = vsub.f32 %v3292_v51, %v1364_v6 }
 0x154   :  { %2426 = vmatprep.subr.mxu1 %v2776_v0  ;;  %2384 = vmatpush3.msra.mxu0 %v734_v4  ;;  %v1256_v4 = vld [vmem:[#allocation8 + $0x48] sm:$0xff] }
 0x155   :  { %2427 = vmatpush3.msra.mxu1 %v3019_v17  ;;  %2385 = vmatprep.subr.mxu0 %v2776_v0  ;;  %v3311_v12 = vand.u32 4294901760, %v1256_v4  ;;  %v3317_v17 = vsub.f32 %v1259_v56, %v3299_v61 }
 0x156   :  { %2428 = vmatprep.subr.mxu1 %v2776_v0  ;;  %2386 = vmatpush3.msra.mxu0 %v741_v10  ;;  %v3306_v10 = vsub.f32 %v1261_v44, %v3294_v53 }
 0x157   :  { %2429 = vmatpush3.msra.mxu1 %v3029_v23  ;;  %2387 = vmatprep.subr.mxu0 %v2776_v0  ;;  %v3334_v28 = vsub.f32 %v1256_v4, %v3311_v12  ;;  %v1385_v35 = vand.u32 4294901760, %v3317_v17 }
 0x158   :  { %2430 = vmatprep.subr.mxu1 %v2776_v0  ;;  %2388 = vmatpush3.msra.mxu0 %v748_v18  ;;  %v3320_v18 = vsub.f32 %v1258_v57, %v3301_v62  ;;  %v1371_v23 = vand.u32 4294901760, %v3306_v10 }
 0x159   :  { %2431 = vmatpush3.msra.mxu1 %v3044_v29  ;;  %2389 = vmatprep.subr.mxu0 %v2776_v0  ;;  %v1378_v29 = vand.u32 4294901760, %v3314_v16  ;;  %v1406_v20 = vand.u32 4294901760, %v3334_v28 }
 0x15a   :  { %2432 = vmatprep.subr.mxu1 %v2776_v0  ;;  %2390 = vmatpush3.msra.mxu0 %v755_v21  ;;  %v3323_v21 = vand.u32 4294901760, %v1255_v5  ;;  %v1392_v43 = vand.u32 4294901760, %v3320_v18 }
 0x15b   :  { %2433 = vmatpush3.msra.mxu1 %v3057_v45  ;;  %2391 = vmatprep.subr.mxu0 %v2776_v0  ;;  %v1366_v45 = vand.u32 4294901760, %v1365_v22  ;;  %v1379_v1 = vsub.f32 %v3314_v16, %v1378_v29  ;;  %v1407_v7 = vsub.f32 %v3334_v28, %v1406_v20 }
 0x15c   :  { %2434 = vmatprep.subr.mxu1 %v2776_v0  ;;  %2392 = vmatpush3.msra.mxu0 %v762_v27  ;;  %v3330_v27 = vsub.f32 %v1257_v63, %v3309_v11  ;;  %v3346_v52 = vsub.f32 %v1255_v5, %v3323_v21  ;;  %v1249_v63 = vld [vmem:[#allocation8 + $0x10] sm:$0xff] }
 0x15d   :  { %2435 = vmatpush3.msra.mxu1 %v3065_v50  ;;  %2393 = vmatprep.subr.mxu0 %v2776_v0  ;;  %v1380_v24 = vand.u32 4294901760, %v1379_v1  ;;  %v1408_v30 = vand.u32 4294901760, %v1407_v7  ;;  %v1248_v1 = vld [vmem:[#allocation8 + $0x8] sm:$0xff] }
 0x15e   :  { %2436 = vmatprep.subr.mxu1 %v2776_v0  ;;  %2394 = vmatpush3.msra.mxu0 %v3669_v34  ;;  %v1399_v50 = vand.u32 4294901760, %v3330_v27  ;;  %v1413_v59 = vand.u32 4294901760, %v3346_v52  ;;  %v1251_v34 = vld [vmem:[#allocation8 + $0x20] sm:$0xff] }
 0x15f   :  { %2437 = vmatpush3.msra.mxu1 %v3079_v2  ;;  %2395 = vmatprep.subr.mxu0 %v2776_v0  ;;  %v1386_v2 = vsub.f32 %v3317_v17, %v1385_v35 }
 0x160   :  { %2438 = vmatprep.subr.mxu1 %v2776_v0  ;;  %2396 = vmatpush3.msra.mxu0 %v3670_v36  ;;  %v1400_v55 = vsub.f32 %v3330_v27, %v1399_v50  ;;  %v1414_v19 = vsub.f32 %v3346_v52, %v1413_v59  ;;  %v1421_v36 = vsub.f32 %v3384_v32, %v1420_v47 }
 0x161   :  { %2439 = vmatpush3.msra.mxu1 %v3089_v14  ;;  %2440 = vmatprep.mubr.msk.f32.mxu1 %vm2777_vm0, %v2776_v0  ;;  %v1393_v14 = vsub.f32 %v3320_v18, %v1392_v43  ;;  %v1387_v31 = vand.u32 4294901760, %v1386_v2 }
 0x162   :  { %2397 = vmatprep.subr.mxu0 %v2776_v0  ;;  %2441 = vmatmul.mubr.f32.vlgmr.msra.gmra.mxu1 %v3122_v49  ;;  %v1401_v15 = vand.u32 4294901760, %v1400_v55  ;;  %v1415_v48 = vand.u32 4294901760, %v1414_v19  ;;  %v1422_v41 = vand.u32 4294901760, %v1421_v36  ;;  %v1247_v55 = vld [vmem:[#allocation8] sm:$0xff] }
 0x163   :  { %2398 = vmatpush3.msra.mxu0 %v3671_v37  ;;  %2405 = vmatprep.mubr.msk.f32.mxu0 %vm2777_vm0, %v2776_v0  ;;  %v1394_v60 = vand.u32 4294901760, %v1393_v14  ;;  %v1427_v37 = vand.u32 4294901760, %v3393_v9 }
 0x164   :  { %2399 = vmatprep.subr.mxu0 %v2776_v0  ;;  %2478 = vmatprep.subr.mxu1 %v2776_v0 }
 0x165   :  { %2400 = vmatpush3.msra.mxu0 %v3672_v38  ;;  %2510 = vmatprep.mubr.msk.f32.mxu1 %vm2777_vm0, %v2776_v0  ;;  %v3405_v38 = vsub.f32 %v1252_v46, %v3395_v3  ;;  %v1428_v44 = vsub.f32 %v3393_v9, %v1427_v37 }
 0x166   :  { %2401 = vmatprep.subr.mxu0 %v2776_v0  ;;  %2479 = vmatpush3.msra.mxu1 %v1366_v45  ;;  %v3428_v45 = vand.u32 4294901760, %v1249_v63 }
 0x167   :  { %2402 = vmatpush3.msra.mxu0 %v3673_v39  ;;  %2480 = vmatprep.subr.mxu1 %v2776_v0  ;;  %v3407_v39 = vand.u32 4294901760, %v1251_v34  ;;  %v1434_v54 = vand.u32 4294901760, %v3405_v38  ;;  %v1429_v4 = vand.u32 4294901760, %v1428_v44 }
 0x168   :  { %2403 = vmatprep.subr.mxu0 %v2776_v0  ;;  %v3439_v14 = vsub.f32 %v1249_v63, %v3428_v45 }
 0x169   :  { %2404 = vmatpush3.msra.mxu0 %v3674_v40  ;;  %v1250_v40 = vld [vmem:[#allocation8 + $0x18] sm:$0xff]  ;;  %v3417_v56 = vsub.f32 %v1251_v34, %v3407_v39  ;;  %v1435_v5 = vsub.f32 %v3405_v38, %v1434_v54 }
 0x16a   :  { %2406 = vmatmul.mubr.f32.vlgmr.msra.gmra.mxu0 %v3122_v49  ;;  %2443 = vmatprep.subr.mxu0 %v2776_v0  ;;  %v1372_v49 = vsub.f32 %v3306_v10, %v1371_v23  ;;  %v3421_v57 = vand.u32 4294901760, %v1250_v40  ;;  %v3667_v7 = vand.u32 4294901760, %v3439_v14 }
 0x16b   :  { %2475 = vmatprep.mubr.msk.f32.mxu0 %vm2777_vm0, %v2776_v0  ;;  %2444 = vmatpush3.msra.mxu0 %v3289_v42  ;;  %v1441_v22 = vand.u32 4294901760, %v3417_v56  ;;  %v1436_v2 = vand.u32 4294901760, %v1435_v5 }
 0x16c   :  { %2445 = vmatprep.subr.mxu0 %v2776_v0  ;;  %v1373_v13 = vand.u32 4294901760, %v1372_v49  ;;  %v3432_v49 = vsub.f32 %v1250_v40, %v3421_v57  ;;  %v1456_v26 = vsub.f32 %v3439_v14, %v3667_v7 }
 0x16d   :  { %2446 = vmatpush3.msra.mxu0 %v3294_v53 }
 0x16e   :  { %2447 = vmatprep.subr.mxu0 %v2776_v0  ;;  %2481 = vmatpush3.msra.mxu1 %v1373_v13  ;;  %v1442_v13 = vsub.f32 %v3417_v56, %v1441_v22  ;;  %v1457_v34 = vand.u32 4294901760, %v1456_v26  ;;  %v1931_v26 = vld [vmem:[%s3655_s4] ss:$0 sm:$0xff] }
 0x16f   :  { %2448 = vmatpush3.msra.mxu0 %v3297_v58  ;;  %2482 = vmatprep.subr.mxu1 %v2776_v0 }
 0x170   :  { %2449 = vmatprep.subr.mxu0 %v2776_v0  ;;  %2483 = vmatpush3.msra.mxu1 %v1380_v24  ;;  %v3441_v24 = vand.u32 4294901760, %v1248_v1 }
 0x171   :  { %2450 = vmatpush3.msra.mxu0 %v3299_v61  ;;  %2484 = vmatprep.subr.mxu1 %v2776_v0 }
 0x172   :  { %2451 = vmatprep.subr.mxu0 %v2776_v0  ;;  %2485 = vmatpush3.msra.mxu1 %v1387_v31  ;;  %v3668_v31 = vand.u32 4294901760, %v3432_v49  ;;  %v3449_v8 = vsub.f32 %v1248_v1, %v3441_v24 }
 0x173   :  { %2452 = vmatpush3.msra.mxu0 %v3301_v62  ;;  %2486 = vmatprep.subr.mxu1 %v2776_v0 }
 0x174   :  { %2453 = vmatprep.subr.mxu0 %v2776_v0  ;;  %2487 = vmatpush3.msra.mxu1 %v1394_v60  ;;  %v1443_v60 = vand.u32 4294901760, %v1442_v13  ;;  %v1449_v19 = vsub.f32 %v3432_v49, %v3668_v31 }
 0x175   :  { %2454 = vmatpush3.msra.mxu0 %v3309_v11  ;;  %2488 = vmatprep.subr.mxu1 %v2776_v0 }
 0x176   :  { %2455 = vmatprep.subr.mxu0 %v2776_v0  ;;  %2489 = vmatpush3.msra.mxu1 %v1401_v15  ;;  %v3451_v15 = vand.u32 4294901760, %v1247_v55 }
 0x177   :  { %2456 = vmatpush3.msra.mxu0 %v3311_v12  ;;  %2490 = vmatprep.subr.mxu1 %v2776_v0 }
 0x178   :  { %2457 = vmatprep.subr.mxu0 %v2776_v0  ;;  %2491 = vmatpush3.msra.mxu1 %v1408_v30  ;;  %v3666_v30 = vand.u32 4294901760, %v3449_v8  ;;  %v3464_v46 = vsub.f32 %v1247_v55, %v3451_v15 }
 0x179   :  { %2458 = vmatpush3.msra.mxu0 %v3323_v21  ;;  %2492 = vmatprep.subr.mxu1 %v2776_v0 }
 0x17a   :  { %2459 = vmatprep.subr.mxu0 %v2776_v0  ;;  %2493 = vmatpush3.msra.mxu1 %v1415_v48  ;;  %v1450_v48 = vand.u32 4294901760, %v1449_v19  ;;  %v1463_v36 = vsub.f32 %v3449_v8, %v3666_v30  ;;  %v3665_v40 = vand.u32 4294901760, %v3464_v46 }
 0x17b   :  { %2460 = vmatpush3.msra.mxu0 %v3378_v25  ;;  %2494 = vmatprep.subr.mxu1 %v2776_v0 }
 0x17c   :  { %2461 = vmatprep.subr.mxu0 %v2776_v0  ;;  %2495 = vmatpush3.msra.mxu1 %v1422_v41  ;;  %v1464_v41 = vand.u32 4294901760, %v1463_v36  ;;  %v1470_v44 = vsub.f32 %v3464_v46, %v3665_v40 }
 0x17d   :  { %2462 = vmatpush3.msra.mxu0 %v3386_v33  ;;  %2496 = vmatprep.subr.mxu1 %v2776_v0 }
 0x17e   :  { %2463 = vmatprep.subr.mxu0 %v2776_v0  ;;  %2497 = vmatpush3.msra.mxu1 %v1429_v4  ;;  %v1471_v63 = vand.u32 4294901760, %v1470_v44 }
 0x17f   :  { %2464 = vmatpush3.msra.mxu0 %v3395_v3  ;;  %2498 = vmatprep.subr.mxu1 %v2776_v0 }
 0x180   :  { %2465 = vmatprep.subr.mxu0 %v2776_v0  ;;  %2499 = vmatpush3.msra.mxu1 %v1436_v2 }
 0x181   :  { %2466 = vmatpush3.msra.mxu0 %v3407_v39  ;;  %2500 = vmatprep.subr.mxu1 %v2776_v0 }
 0x182   :  { %2467 = vmatprep.subr.mxu0 %v2776_v0  ;;  %2501 = vmatpush3.msra.mxu1 %v1443_v60 }
 0x183   :  { %2468 = vmatpush3.msra.mxu0 %v3421_v57  ;;  %2502 = vmatprep.subr.mxu1 %v2776_v0 }
 0x184   :  { %2469 = vmatprep.subr.mxu0 %v2776_v0  ;;  %2503 = vmatpush3.msra.mxu1 %v1450_v48 }
 0x185   :  { %2470 = vmatpush3.msra.mxu0 %v3428_v45  ;;  %2504 = vmatprep.subr.mxu1 %v2776_v0 }
 0x186   :  { %2471 = vmatprep.subr.mxu0 %v2776_v0  ;;  %2505 = vmatpush3.msra.mxu1 %v1457_v34 }
 0x187   :  { %2472 = vmatpush3.msra.mxu0 %v3441_v24  ;;  %2506 = vmatprep.subr.mxu1 %v2776_v0 }
 0x188   :  { %2473 = vmatprep.subr.mxu0 %v2776_v0  ;;  %2507 = vmatpush3.msra.mxu1 %v1464_v41 }
 0x189   :  { %2474 = vmatpush3.msra.mxu0 %v3451_v15  ;;  %2508 = vmatprep.subr.mxu1 %v2776_v0 }
 0x18a   :  { %2513 = vmatprep.subr.mxu0 %v2776_v0  ;;  %2509 = vmatpush3.msra.mxu1 %v1471_v63 }
 0x18b   :  { %2548 = vmatprep.subr.mxu1 %v2776_v0 }
 0x1e0   :  { %v843_v4 = vpop.f32.mrf.mxu1 }
 0x1e2   :  { %v2302_v5 = vpop.f32.mrf.mxu1 }
 0x1e8   :  { %v692_v1 = vpop.f32.mrf.mxu0 }
 0x1e9   :  { %v693_v48 = vadd.f32 %v1931_v26, %v692_v1 }
 0x1ea   :  { %v2267_v2 = vpop.f32.mrf.mxu0 }
 0x1eb   :  { %v844_v36 = vadd.f32 %v843_v4, %v693_v48 }
 0x200   :  { %v1036_v13 = vpop.f32.mrf.mxu1 }
 0x202   :  { %v2372_v55 = vpop.f32.mrf.mxu1 }
 0x209   :  { %v947_v60 = vpop.f32.mrf.mxu0 }
 0x20a   :  { %v948_v44 = vadd.f32 %v947_v60, %v844_v36 }
 0x20b   :  { %v2337_v19 = vpop.f32.mrf.mxu0 }
 0x20c   :  { %v1037_v63 = vadd.f32 %v1036_v13, %v948_v44 }
 0x222   :  { %v1242_v34 = vpop.f32.mrf.mxu1 }
 0x224   :  { %v2442_v41 = vpop.f32.mrf.mxu1 }
 0x22a   :  { %v1155_v40 = vpop.f32.mrf.mxu0 }
 0x22b   :  { %v1156_v30 = vadd.f32 %v1155_v40, %v1037_v63 }
 0x22c   :  { %v2407_v7 = vpop.f32.mrf.mxu0 }
 0x22d   :  { %v1243_v5 = vadd.f32 %v1242_v34, %v1156_v30 }
 0x22f   :  { %v1246_v31 = vmax.f32 %v1243_v5, 0.0 }
 0x231   :  { %v3484_v2 = vand.u32 4294901760, %v1246_v31 }
 0x233   :  { %v3487_v55 = vsub.f32 %v1246_v31, %v3484_v2  ;;  %2511 = vmatmul.mubr.f32.vlgmr.msra.gmra.mxu1 %v3484_v2 }
 0x234   :  { %2549 = vmatpush3.msra.mxu1 %v3289_v42  ;;  %2580 = vmatprep.mubr.msk.f32.mxu1 %vm2777_vm0, %v2776_v0 }
 0x235   :  { %v1353_v4 = vand.u32 4294901760, %v3487_v55  ;;  %2550 = vmatprep.subr.mxu1 %v2776_v0 }
 0x236   :  { %2551 = vmatpush3.msra.mxu1 %v3294_v53 }
 0x237   :  { %2552 = vmatprep.subr.mxu1 %v2776_v0  ;;  %v1354_v7 = vsub.f32 %v3487_v55, %v1353_v4 }
 0x238   :  { %2553 = vmatpush3.msra.mxu1 %v3297_v58 }
 0x239   :  { %2554 = vmatprep.subr.mxu1 %v2776_v0  ;;  %v1355_v31 = vand.u32 4294901760, %v1354_v7 }
 0x23a   :  { %2555 = vmatpush3.msra.mxu1 %v3299_v61 }
 0x23b   :  { %2556 = vmatprep.subr.mxu1 %v2776_v0  ;;  %2476 = vmatmul.mubr.f32.vlgmr.msra.gmra.mxu0 %v1355_v31 }
 0x23c   :  { %2514 = vmatpush3.msra.mxu0 %v3292_v51  ;;  %2557 = vmatpush3.msra.mxu1 %v3301_v62  ;;  %v3676_v51 = vand.u32 4294901760, %v3439_v14 }
 0x23d   :  { %2515 = vmatprep.subr.mxu0 %v2776_v0  ;;  %2558 = vmatprep.subr.mxu1 %v2776_v0 }
 0x23e   :  { %2516 = vmatpush3.msra.mxu0 %v3306_v10  ;;  %2559 = vmatpush3.msra.mxu1 %v3309_v11 }
 0x23f   :  { %2517 = vmatprep.subr.mxu0 %v2776_v0  ;;  %2560 = vmatprep.subr.mxu1 %v2776_v0 }
 0x240   :  { %2518 = vmatpush3.msra.mxu0 %v3314_v16  ;;  %2561 = vmatpush3.msra.mxu1 %v3311_v12 }
 0x241   :  { %2519 = vmatprep.subr.mxu0 %v2776_v0  ;;  %2562 = vmatprep.subr.mxu1 %v2776_v0 }
 0x242   :  { %2520 = vmatpush3.msra.mxu0 %v3317_v17  ;;  %2563 = vmatpush3.msra.mxu1 %v3323_v21 }
 0x243   :  { %2521 = vmatprep.subr.mxu0 %v2776_v0  ;;  %2564 = vmatprep.subr.mxu1 %v2776_v0 }
 0x244   :  { %2522 = vmatpush3.msra.mxu0 %v3320_v18  ;;  %2565 = vmatpush3.msra.mxu1 %v3378_v25  ;;  %v1932_v18 = vld [vmem:[%s3657_s6] ss:$0 sm:$0xff] }
 0x245   :  { %2523 = vmatprep.subr.mxu0 %v2776_v0  ;;  %2566 = vmatprep.subr.mxu1 %v2776_v0 }
 0x246   :  { %2524 = vmatpush3.msra.mxu0 %v3330_v27  ;;  %2567 = vmatpush3.msra.mxu1 %v3386_v33 }
 0x247   :  { %2525 = vmatprep.subr.mxu0 %v2776_v0  ;;  %2568 = vmatprep.subr.mxu1 %v2776_v0 }
 0x248   :  { %2526 = vmatpush3.msra.mxu0 %v3334_v28  ;;  %2569 = vmatpush3.msra.mxu1 %v3395_v3 }
 0x249   :  { %2527 = vmatprep.subr.mxu0 %v2776_v0  ;;  %2570 = vmatprep.subr.mxu1 %v2776_v0 }
 0x24a   :  { %2528 = vmatpush3.msra.mxu0 %v3346_v52  ;;  %2571 = vmatpush3.msra.mxu1 %v3407_v39 }
 0x24b   :  { %2529 = vmatprep.subr.mxu0 %v2776_v0  ;;  %2572 = vmatprep.subr.mxu1 %v2776_v0 }
 0x24c   :  { %2530 = vmatpush3.msra.mxu0 %v3384_v32  ;;  %2573 = vmatpush3.msra.mxu1 %v3421_v57 }
 0x24d   :  { %2531 = vmatprep.subr.mxu0 %v2776_v0  ;;  %2574 = vmatprep.subr.mxu1 %v2776_v0 }
 0x24e   :  { %2532 = vmatpush3.msra.mxu0 %v3393_v9  ;;  %2575 = vmatpush3.msra.mxu1 %v3428_v45 }
 0x24f   :  { %2533 = vmatprep.subr.mxu0 %v2776_v0  ;;  %2576 = vmatprep.subr.mxu1 %v2776_v0 }
 0x250   :  { %2534 = vmatpush3.msra.mxu0 %v3405_v38  ;;  %2577 = vmatpush3.msra.mxu1 %v3441_v24 }
 0x251   :  { %2535 = vmatprep.subr.mxu0 %v2776_v0  ;;  %2578 = vmatprep.subr.mxu1 %v2776_v0 }
 0x252   :  { %2536 = vmatpush3.msra.mxu0 %v3417_v56  ;;  %2579 = vmatpush3.msra.mxu1 %v3451_v15 }
 0x253   :  { %2537 = vmatprep.subr.mxu0 %v2776_v0  ;;  %2581 = vmatmul.mubr.f32.vlgmr.msra.gmra.mxu1 %v1353_v4 }
 0x254   :  { %2618 = vmatprep.subr.mxu1 %v2776_v0  ;;  %2538 = vmatpush3.msra.mxu0 %v3432_v49 }
 0x255   :  { %2619 = vmatpush3.msra.mxu1 %v3289_v42  ;;  %2539 = vmatprep.subr.mxu0 %v2776_v0  ;;  %v3675_v42 = vand.u32 4294901760, %v3432_v49 }
 0x256   :  { %2620 = vmatprep.subr.mxu1 %v2776_v0  ;;  %2540 = vmatpush3.msra.mxu0 %v3439_v14 }
 0x257   :  { %2621 = vmatpush3.msra.mxu1 %v3294_v53  ;;  %2541 = vmatprep.subr.mxu0 %v2776_v0  ;;  %v3677_v53 = vand.u32 4294901760, %v3449_v8 }
 0x258   :  { %2622 = vmatprep.subr.mxu1 %v2776_v0  ;;  %2542 = vmatpush3.msra.mxu0 %v3449_v8 }
 0x259   :  { %2623 = vmatpush3.msra.mxu1 %v3297_v58  ;;  %2543 = vmatprep.subr.mxu0 %v2776_v0  ;;  %v3678_v58 = vand.u32 4294901760, %v3464_v46 }
 0x25a   :  { %2624 = vmatprep.subr.mxu1 %v2776_v0  ;;  %2544 = vmatpush3.msra.mxu0 %v3464_v46 }
 0x25b   :  { %2545 = vmatprep.mubr.msk.f32.mxu0 %vm2777_vm0, %v2776_v0  ;;  %2625 = vmatpush3.msra.mxu1 %v3299_v61 }
 0x25c   :  { %2546 = vmatmul.mubr.f32.vlgmr.msra.gmra.mxu0 %v3487_v55  ;;  %2583 = vmatprep.subr.mxu0 %v2776_v0 }
 0x25d   :  { %2626 = vmatprep.subr.mxu1 %v2776_v0  ;;  %2584 = vmatpush3.msra.mxu0 %v1364_v6 }
 0x25e   :  { %2627 = vmatpush3.msra.mxu1 %v3301_v62  ;;  %2585 = vmatprep.subr.mxu0 %v2776_v0 }
 0x25f   :  { %2628 = vmatprep.subr.mxu1 %v2776_v0  ;;  %2586 = vmatpush3.msra.mxu0 %v1371_v23 }
 0x260   :  { %2629 = vmatpush3.msra.mxu1 %v3309_v11  ;;  %2587 = vmatprep.subr.mxu0 %v2776_v0 }
 0x261   :  { %2630 = vmatprep.subr.mxu1 %v2776_v0  ;;  %2588 = vmatpush3.msra.mxu0 %v1378_v29 }
 0x262   :  { %2631 = vmatpush3.msra.mxu1 %v3311_v12  ;;  %2589 = vmatprep.subr.mxu0 %v2776_v0 }
 0x263   :  { %2632 = vmatprep.subr.mxu1 %v2776_v0  ;;  %2590 = vmatpush3.msra.mxu0 %v1385_v35 }
 0x264   :  { %2633 = vmatpush3.msra.mxu1 %v3323_v21  ;;  %2591 = vmatprep.subr.mxu0 %v2776_v0 }
 0x265   :  { %2634 = vmatprep.subr.mxu1 %v2776_v0  ;;  %2592 = vmatpush3.msra.mxu0 %v1392_v43 }
 0x266   :  { %2635 = vmatpush3.msra.mxu1 %v3378_v25  ;;  %2593 = vmatprep.subr.mxu0 %v2776_v0 }
 0x267   :  { %2636 = vmatprep.subr.mxu1 %v2776_v0  ;;  %2594 = vmatpush3.msra.mxu0 %v1399_v50 }
 0x268   :  { %2637 = vmatpush3.msra.mxu1 %v3386_v33  ;;  %2595 = vmatprep.subr.mxu0 %v2776_v0 }
 0x269   :  { %2638 = vmatprep.subr.mxu1 %v2776_v0  ;;  %2596 = vmatpush3.msra.mxu0 %v1406_v20 }
 0x26a   :  { %2639 = vmatpush3.msra.mxu1 %v3395_v3  ;;  %2597 = vmatprep.subr.mxu0 %v2776_v0 }
 0x26b   :  { %2640 = vmatprep.subr.mxu1 %v2776_v0  ;;  %2598 = vmatpush3.msra.mxu0 %v1413_v59 }
 0x26c   :  { %2641 = vmatpush3.msra.mxu1 %v3407_v39  ;;  %2599 = vmatprep.subr.mxu0 %v2776_v0 }
 0x26d   :  { %2642 = vmatprep.subr.mxu1 %v2776_v0  ;;  %2600 = vmatpush3.msra.mxu0 %v1420_v47 }
 0x26e   :  { %2643 = vmatpush3.msra.mxu1 %v3421_v57  ;;  %2601 = vmatprep.subr.mxu0 %v2776_v0 }
 0x26f   :  { %2644 = vmatprep.subr.mxu1 %v2776_v0  ;;  %2602 = vmatpush3.msra.mxu0 %v1427_v37 }
 0x270   :  { %2645 = vmatpush3.msra.mxu1 %v3428_v45  ;;  %2603 = vmatprep.subr.mxu0 %v2776_v0 }
 0x271   :  { %2646 = vmatprep.subr.mxu1 %v2776_v0  ;;  %2604 = vmatpush3.msra.mxu0 %v1434_v54 }
 0x272   :  { %2647 = vmatpush3.msra.mxu1 %v3441_v24  ;;  %2605 = vmatprep.subr.mxu0 %v2776_v0 }
 0x273   :  { %2648 = vmatprep.subr.mxu1 %v2776_v0  ;;  %2606 = vmatpush3.msra.mxu0 %v1441_v22 }
 0x274   :  { %2649 = vmatpush3.msra.mxu1 %v3451_v15  ;;  %2650 = vmatprep.mubr.msk.f32.mxu1 %vm2777_vm0, %v2776_v0 }
 0x275   :  { %2607 = vmatprep.subr.mxu0 %v2776_v0  ;;  %2651 = vmatmul.mubr.f32.vlgmr.msra.gmra.mxu1 %v3484_v2 }
 0x276   :  { %2608 = vmatpush3.msra.mxu0 %v3675_v42  ;;  %2615 = vmatprep.mubr.msk.f32.mxu0 %vm2777_vm0, %v2776_v0 }
 0x277   :  { %2609 = vmatprep.subr.mxu0 %v2776_v0 }
 0x278   :  { %2610 = vmatpush3.msra.mxu0 %v3676_v51 }
 0x279   :  { %2611 = vmatprep.subr.mxu0 %v2776_v0 }
 0x27a   :  { %2612 = vmatpush3.msra.mxu0 %v3677_v53 }
 0x27b   :  { %2613 = vmatprep.subr.mxu0 %v2776_v0 }
 0x27c   :  { %2614 = vmatpush3.msra.mxu0 %v3678_v58 }
 0x27d   :  { %2616 = vmatmul.mubr.f32.vlgmr.msra.gmra.mxu0 %v3484_v2 }
 0x2f3   :  { %v1508_v61 = vpop.f32.mrf.mxu1 }
 0x2f5   :  { %v2512_v62 = vpop.f32.mrf.mxu1 }
 0x2fb   :  { %v1357_v6 = vpop.f32.mrf.mxu0 }
 0x2fc   :  { %v1358_v21 = vadd.f32 %v1932_v18, %v1357_v6 }
 0x2fd   :  { %v2477_v10 = vpop.f32.mrf.mxu0 }
 0x2fe   :  { %v1509_v0 = vadd.f32 %v1508_v61, %v1358_v21 }
 0x313   :  { %v1701_v11 = vpop.f32.mrf.mxu1 }
 0x315   :  { %v2582_v12 = vpop.f32.mrf.mxu1 }
 0x31c   :  { %v1612_v16 = vpop.f32.mrf.mxu0 }
 0x31d   :  { %v1613_v28 = vadd.f32 %v1612_v16, %v1509_v0 }
 0x31e   :  { %v2547_v17 = vpop.f32.mrf.mxu0 }
 0x31f   :  { %v1702_v29 = vadd.f32 %v1701_v11, %v1613_v28 }
 0x335   :  { %v1907_v23 = vpop.f32.mrf.mxu1 }
 0x337   :  { %v2652_v27 = vpop.f32.mrf.mxu1 }
 0x33d   :  { %v1820_v35 = vpop.f32.mrf.mxu0 }
 0x33e   :  { %v1821_v43 = vadd.f32 %v1820_v35, %v1702_v29 }
 0x33f   :  { %v2617_v50 = vpop.f32.mrf.mxu0 }
 0x340   :  { %v1908_v52 = vadd.f32 %v1907_v23, %v1821_v43 }
 0x342   :  { %1912 = vst.msk [vmem:[#allocation10] sm:$0xff] %vm1911_vm2, %v1908_v52 }
 0x343   :  { %2753 = shalt.err (!%p2750_p10)
}
 0x344   :  { %1922 = dma.vmem_to_hbm [thread:$0]  %s1920_s24, 128, %s3658_s7, [#allocation4]  }
 0x345   :  { %2768 = dma.done.wait [#allocation4], 128  }
 0x346   :  { %2769 = vsyncadd [#allocation4], 4294967168 }
 0x347   :  { %1926 = vsyncpa [#allocation3], 1 }
 0x348   :  { %1927 = vsyncpa [#allocation6], 1 }
 0x349   :  { %1928 = vsyncpa [#allocation9], 1 }
 0x34a   :  { %1929 = vsyncpa [#allocation4], 1 }

</bundles_post_ra>
